<compile_context>
chip_gen: v7x
topology: tpu7x:2x2x1
jax: 0.10.0
libtpu: 0.0.40
codegen_flags: <defaults>
</compile_context>

<pallas_src>
import functools
import math

import jax
import jax.numpy as jnp
from jax.experimental import pallas as pl
from jax.experimental.pallas import tpu as pltpu


def actor_kernel(x_ref, w1_ref, b1_ref, w2_ref, b2_ref, ab_ref, o_ref):
    # Layer 1: Linear(input_dim, 128) + ReLU.
    # bf16 operands on the MXU, f32 accumulate; bias/relu in f32 on the VPU.
    x = x_ref[...].astype(jnp.bfloat16)
    h = jnp.dot(x, w1_ref[...], preferred_element_type=jnp.float32)
    h = jnp.maximum(h + b1_ref[...], 0.0)
    # Layer 2: Linear(128, output_dim) + tanh (EUP) + action_bound scale.
    y = jnp.dot(h.astype(jnp.bfloat16), w2_ref[...],
                preferred_element_type=jnp.float32)
    y = jnp.tanh(y + b2_ref[...])
    o_ref[...] = (y * ab_ref[0, 0]).astype(o_ref.dtype)


def _cdiv(a, b):
    return (a + b - 1) // b


def _round_up(x, m):
    return (x + m - 1) // m * m


def _choose_tile(batch, block_rows):
    """Pick (tb, b_pad): tb multiple of 8, b_pad multiple of tb covering batch.

    Guarantees >= 2 grid steps when the batch has >= 16 rows so the "parallel"
    batch axis can be sharded across the two TensorCores on v7x.
    """
    block_rows = max(8, (block_rows // 8) * 8)   # enforce (8,128) sublane rule
    b_pad8 = _round_up(batch, 8)
    nsteps = _cdiv(b_pad8, block_rows)
    if nsteps < 2 and b_pad8 >= 16:
        nsteps = 2                               # engage both TCs on v7x
    tb = _round_up(_cdiv(b_pad8, nsteps), 8)
    return tb, nsteps * tb


@functools.partial(jax.jit, static_argnames=("block_rows",))
def actor_forward(state, w_fc, b_fc, w_out, b_out, action_bound, *,
                  block_rows=2048):
    """state: (B, input_dim) f32 (or bf16). Weights stored transposed (in, out).

    Returns (B, output_dim) f32 = tanh(relu(state@w_fc+b_fc)@w_out+b_out) * action_bound.
    """
    B, input_dim = state.shape
    hidden, out_dim = w_out.shape

    tb, b_pad = _choose_tile(B, block_rows)
    if b_pad != B:
        state = jnp.pad(state, ((0, b_pad - B), (0, 0)))

    # Weights in bf16 (MXU-native, half the resident-weight DMA); biases f32.
    w1 = w_fc.astype(jnp.bfloat16)
    w2 = w_out.astype(jnp.bfloat16)
    b1 = b_fc.reshape(1, hidden).astype(jnp.float32)
    b2 = b_out.reshape(1, out_dim).astype(jnp.float32)
    ab = jnp.asarray(action_bound, jnp.float32).reshape(1, 1)  # SMEM scalar

    grid = (b_pad // tb,)
    resident = pl.Buffered(1)  # constant index_map -> single buffer is enough

    flops = 2 * b_pad * (input_dim * hidden + hidden * out_dim)
    bytes_accessed = (
        b_pad * input_dim * state.dtype.itemsize   # state stream in
        + b_pad * out_dim * 4                      # output stream out
        + input_dim * hidden * 2                   # w1 (bf16)
        + hidden * out_dim * 2                     # w2 (bf16)
        + (hidden + out_dim + 1) * 4               # biases + action_bound
    )

    out = pl.pallas_call(
        actor_kernel,
        out_shape=jax.ShapeDtypeStruct((b_pad, out_dim), jnp.float32),
        grid=grid,
        in_specs=[
            # state tile: streamed, double-buffered by default.
            pl.BlockSpec((tb, input_dim), lambda i: (i, 0)),
            # Weights / biases: VMEM-resident (constant block index), single
            # pipeline buffer.
            pl.BlockSpec((input_dim, hidden), lambda i: (0, 0),
                         pipeline_mode=resident),
            pl.BlockSpec((1, hidden), lambda i: (0, 0),
                         pipeline_mode=resident),
            pl.BlockSpec((hidden, out_dim), lambda i: (0, 0),
                         pipeline_mode=resident),
            pl.BlockSpec((1, out_dim), lambda i: (0, 0),
                         pipeline_mode=resident),
            # action_bound scalar through SMEM.
            pl.BlockSpec(memory_space=pltpu.MemorySpace.SMEM),
        ],
        out_specs=pl.BlockSpec((tb, out_dim), lambda i: (i, 0)),
        compiler_params=pltpu.CompilerParams(
            # Batch tiles are independent -> shard across TCs on v7x megacore.
            dimension_semantics=("parallel",),
            # Headroom for big tiles: narrow tiles lane-pad to 128 in VMEM, and
            # v5e's scoped default is only 16 MiB.  32 MiB fits every chip.
            vmem_limit_bytes=32 * 1024 * 1024,
        ),
        cost_estimate=pl.CostEstimate(
            flops=flops,
            transcendentals=b_pad * out_dim,
            bytes_accessed=bytes_accessed,
        ),
    )(state, w1, b1, w2, b2, ab)

    return out[:B]


def init_actor_params(key, input_dim, output_dim, hidden=128):
    """nn.Linear-style init (uniform +/- 1/sqrt(fan_in)); weights stored (in, out)."""
    k1, k2, k3, k4 = jax.random.split(key, 4)
    lim1 = 1.0 / math.sqrt(input_dim)
    lim2 = 1.0 / math.sqrt(hidden)
    w_fc = jax.random.uniform(k1, (input_dim, hidden), jnp.float32, -lim1, lim1)
    b_fc = jax.random.uniform(k2, (hidden,), jnp.float32, -lim1, lim1)
    w_out = jax.random.uniform(k3, (hidden, output_dim), jnp.float32, -lim2, lim2)
    b_out = jax.random.uniform(k4, (output_dim,), jnp.float32, -lim2, lim2)
    return w_fc, b_fc, w_out, b_out


def _reference(state, w_fc, b_fc, w_out, b_out, action_bound):
    return jnp.tanh(jnp.maximum(state @ w_fc + b_fc, 0.0) @ w_out + b_out) * action_bound


if __name__ == "__main__":
    key = jax.random.PRNGKey(0)
    kx, kp, kx2, kx3 = jax.random.split(key, 4)

    batch, input_dim, output_dim = 2, 8, 4
    action_bound = 2.0

    state = jax.random.normal(kx, (batch, input_dim), jnp.float32)
    w_fc, b_fc, w_out, b_out = init_actor_params(kp, input_dim, output_dim)

    # Tiny-batch path (single tile, padded 2 -> 8 rows).
    out = actor_forward(state, w_fc, b_fc, w_out, b_out, action_bound)
    out = jax.block_until_ready(out)
    ref = _reference(state, w_fc, b_fc, w_out, b_out, action_bound)
    assert out.shape == (batch, output_dim)
    # bf16 matmul operands with f32 accumulation -> relaxed tolerance vs f32 ref.
    assert jnp.allclose(out, ref, atol=3e-2, rtol=3e-2), jnp.max(jnp.abs(out - ref))

    # Medium batch with default block_rows: exercises the ">=2 grid steps"
    # (megacore) split and tail padding (40 rows -> 2 tiles of 24).
    mid_batch = 40
    state_mid = jax.random.normal(kx3, (mid_batch, input_dim), jnp.float32)
    out_mid = actor_forward(state_mid, w_fc, b_fc, w_out, b_out, action_bound)
    out_mid = jax.block_until_ready(out_mid)
    ref_mid = _reference(state_mid, w_fc, b_fc, w_out, b_out, action_bound)
    assert out_mid.shape == (mid_batch, output_dim)
    assert jnp.allclose(out_mid, ref_mid, atol=3e-2, rtol=3e-2)

    # Multi-tile path with a small explicit block_rows: exercises the batch
    # grid (>2 steps), resident weights and tail padding.
    big_batch = 300
    state_big = jax.random.normal(kx2, (big_batch, input_dim), jnp.float32)
    out_big = actor_forward(state_big, w_fc, b_fc, w_out, b_out, action_bound,
                            block_rows=128)
    out_big = jax.block_until_ready(out_big)
    ref_big = _reference(state_big, w_fc, b_fc, w_out, b_out, action_bound)
    assert out_big.shape == (big_batch, output_dim)
    assert jnp.allclose(out_big, ref_big, atol=3e-2, rtol=3e-2)

    print("KERNEL_OK")
</pallas_src>

<mosaic_0001>
module attributes {stable_mosaic.version = 11 : i64} {
  func.func @actor_kernel(%arg0: i32, %arg1: memref<8x8xf32, #tpu.memory_space<vmem>>, %arg2: memref<8x128xbf16, #tpu.memory_space<vmem>>, %arg3: memref<1x128xf32, #tpu.memory_space<vmem>>, %arg4: memref<128x4xbf16, #tpu.memory_space<vmem>>, %arg5: memref<1x4xf32, #tpu.memory_space<vmem>>, %arg6: memref<1x1xf32, #tpu.memory_space<smem>>, %arg7: memref<8x4xf32, #tpu.memory_space<vmem>>) attributes {dimension_semantics = [#tpu.dimension_semantics<parallel>], iteration_bounds = array<i64: 1>, scalar_prefetch = 0 : i64, scratch_operands = 0 : i64, tpu.core_type = #tpu.core_type<tc>, window_params = [{transform_indices = @transform_0, window_bounds = array<i64: 8, 8>}, {pipeline_mode = #tpu.pipeline_mode<synchronous>, transform_indices = @transform_1, window_bounds = array<i64: 8, 128>}, {pipeline_mode = #tpu.pipeline_mode<synchronous>, transform_indices = @transform_2, window_bounds = array<i64: 1, 128>}, {pipeline_mode = #tpu.pipeline_mode<synchronous>, transform_indices = @transform_3, window_bounds = array<i64: 128, 4>}, {pipeline_mode = #tpu.pipeline_mode<synchronous>, transform_indices = @transform_4, window_bounds = array<i64: 1, 4>}, {transform_indices = @transform_5, window_bounds = array<i64: 1, 1>}, {transform_indices = @transform_6, window_bounds = array<i64: 8, 4>}]} {
    %c0 = arith.constant 0 : index
    %c0_0 = arith.constant 0 : index
    %0 = vector.load %arg1[%c0, %c0_0] : memref<8x8xf32, #tpu.memory_space<vmem>>, vector<8x8xf32>
    %1 = arith.truncf %0 : vector<8x8xf32> to vector<8x8xbf16>
    %c0_1 = arith.constant 0 : index
    %c0_2 = arith.constant 0 : index
    %2 = vector.load %arg2[%c0_1, %c0_2] : memref<8x128xbf16, #tpu.memory_space<vmem>>, vector<8x128xbf16>
    %cst = arith.constant dense<0.000000e+00> : vector<8x128xf32>
    %3 = tpu.matmul %1, %2, %cst {dimension_numbers = #tpu.dot_dimension_numbers<[1], [0], [0], [1], [0, 0, 1, 1], [], []>} : vector<8x8xbf16>, vector<8x128xbf16>, vector<8x128xf32> -> vector<8x128xf32>
    %c0_3 = arith.constant 0 : index
    %c0_4 = arith.constant 0 : index
    %4 = vector.load %arg3[%c0_3, %c0_4] : memref<1x128xf32, #tpu.memory_space<vmem>>, vector<1x128xf32>
    %5 = vector.broadcast %4 : vector<1x128xf32> to vector<8x128xf32>
    %6 = arith.addf %3, %5 : vector<8x128xf32>
    %cst_5 = arith.constant 0.000000e+00 : f32
    %7 = vector.broadcast %cst_5 : f32 to vector<8x128xf32>
    %8 = arith.maximumf %6, %7 : vector<8x128xf32>
    %9 = arith.truncf %8 : vector<8x128xf32> to vector<8x128xbf16>
    %c0_6 = arith.constant 0 : index
    %c0_7 = arith.constant 0 : index
    %10 = vector.load %arg4[%c0_6, %c0_7] : memref<128x4xbf16, #tpu.memory_space<vmem>>, vector<128x4xbf16>
    %cst_8 = arith.constant dense<0.000000e+00> : vector<8x4xf32>
    %11 = tpu.matmul %9, %10, %cst_8 {dimension_numbers = #tpu.dot_dimension_numbers<[1], [0], [0], [1], [0, 0, 1, 1], [], []>} : vector<8x128xbf16>, vector<128x4xbf16>, vector<8x4xf32> -> vector<8x4xf32>
    %c0_9 = arith.constant 0 : index
    %c0_10 = arith.constant 0 : index
    %12 = vector.load %arg5[%c0_9, %c0_10] : memref<1x4xf32, #tpu.memory_space<vmem>>, vector<1x4xf32>
    %13 = vector.broadcast %12 : vector<1x4xf32> to vector<8x4xf32>
    %14 = arith.addf %11, %13 : vector<8x4xf32>
    %15 = math.tanh %14 : vector<8x4xf32>
    %c0_11 = arith.constant 0 : index
    %c0_12 = arith.constant 0 : index
    %16 = memref.load %arg6[%c0_11, %c0_12] : memref<1x1xf32, #tpu.memory_space<smem>>
    %17 = vector.broadcast %16 : f32 to vector<8x4xf32>
    %18 = arith.mulf %15, %17 : vector<8x4xf32>
    %c0_13 = arith.constant 0 : index
    %c0_14 = arith.constant 0 : index
    %19 = vector.load %arg7[%c0_13, %c0_14] : memref<8x4xf32, #tpu.memory_space<vmem>>, vector<8x4xf32>
    tpu.vector_store %arg7[%c0_13, %c0_14], %18 {strides = array<i32>} : memref<8x4xf32, #tpu.memory_space<vmem>>, vector<8x4xf32>,
    return
  }
  func.func @transform_0(%arg0: i32) -> (i32, i32) {
    %c0_i32 = arith.constant 0 : i32
    %c0_i32_0 = arith.constant 0 : i32
    return %arg0, %c0_i32 : i32, i32
  }
  func.func @transform_1(%arg0: i32) -> (i32, i32) {
    %c0_i32 = arith.constant 0 : i32
    %c0_i32_0 = arith.constant 0 : i32
    %c0_i32_1 = arith.constant 0 : i32
    return %c0_i32, %c0_i32_0 : i32, i32
  }
  func.func @transform_2(%arg0: i32) -> (i32, i32) {
    %c0_i32 = arith.constant 0 : i32
    %c0_i32_0 = arith.constant 0 : i32
    %c0_i32_1 = arith.constant 0 : i32
    return %c0_i32, %c0_i32_0 : i32, i32
  }
  func.func @transform_3(%arg0: i32) -> (i32, i32) {
    %c0_i32 = arith.constant 0 : i32
    %c0_i32_0 = arith.constant 0 : i32
    %c0_i32_1 = arith.constant 0 : i32
    return %c0_i32, %c0_i32_0 : i32, i32
  }
  func.func @transform_4(%arg0: i32) -> (i32, i32) {
    %c0_i32 = arith.constant 0 : i32
    %c0_i32_0 = arith.constant 0 : i32
    %c0_i32_1 = arith.constant 0 : i32
    return %c0_i32, %c0_i32_0 : i32, i32
  }
  func.func @transform_5(%arg0: i32) -> (i32, i32) {
    %c0_i32 = arith.constant 0 : i32
    %c0_i32_0 = arith.constant 0 : i32
    %c0_i32_1 = arith.constant 0 : i32
    return %c0_i32, %c0_i32_0 : i32, i32
  }
  func.func @transform_6(%arg0: i32) -> (i32, i32) {
    %c0_i32 = arith.constant 0 : i32
    %c0_i32_0 = arith.constant 0 : i32
    return %arg0, %c0_i32 : i32, i32
  }
}

</mosaic_0001>

<bundles_post_ra>
// kernel: actor_forward.1
= control target key start
LH: loop header
LB: loop body
LE: loop exit
PB: predicated region body
PF: predicated region fallthrough
CT: control target
= control target key end

     0   :  { %vm39_vm0 = vcmask 1043456   ;;  %v266_v0 = vmov 0.0   ;;  %vm267_vm1 = vmmov 0   ;;  %vm35_vm2 = vcmask 64512   ;;  %s345_s1 = inlined_call_operand.vmem [shape: bf16[8,128], index: 1, kind: input, shape index: {}]   ;;  %s346_s0 = inlined_call_operand.vmem [shape: f32[8,8], index: 0, kind: input, shape index: {}]   ;;  %s347_s3 = inlined_call_operand.vmem [shape: bf16[128,4], index: 3, kind: input, shape index: {}]   ;;  %s348_s2 = inlined_call_operand.vmem [shape: f32[1,128], index: 2, kind: input, shape index: {}]   ;;  %s349_s4 = inlined_call_operand.vmem [shape: f32[1,4], index: 4, kind: input, shape index: {}]   ;;  %s350_s5 = inlined_call_operand.<no memory space> [shape: f32[1,1], index: 5, kind: input, shape index: {}]   ;;  %s351_s6 = inlined_call_operand.vmem [shape: f32[8,4], index: 6, kind: output, shape index: {}]  }
   0x1   :  { %228 = vmatprep.subr.bf16.mxu0 %v266_v0  ;;  %v27_v1 = vld [vmem:[%s345_s1] sm:$0xf]  ;;  %230 = vmatprep.mubr.msk.bf16.mxu0 %vm267_vm1, %v266_v0  ;;  %v257_v6 = vld [vmem:[%s347_s3 + $0x8] sm:$0xff]   ;;  %v258_v7 = vld [vmem:[%s347_s3 + $0x10] sm:$0xff]   ;;  %v198_v27 = vstv %s350_s5  ;;  %vm200_vm3 = vcmask 31744  }
   0x2   :  { %v25_v2 = vld [vmem:[%s346_s0] sm:$0xff]  ;;  %v41_v3 = vsel %vm39_vm0, %v27_v1, 0  ;;  %234 = vmatprep.subr.bf16.mxu1 %v266_v0  ;;  %250 = vmatprep.mubr.msk.bf16.mxu1 %vm267_vm1, %v266_v0  ;;  %v259_v8 = vld [vmem:[%s347_s3 + $0x18] sm:$0xff]   ;;  %v261_v10 = vld [vmem:[%s347_s3 + $0x28] sm:$0xff]  }
   0x3   :  { %v26_v4 = vpack.c.bf16 %v25_v2, %v25_v2  ;;  %v256_v5 = vld [vmem:[%s347_s3] sm:$0xff]   ;;  %229 = vmatpush3.bf16.msra.mxu0 %v41_v3  ;;  %v262_v11 = vld [vmem:[%s347_s3 + $0x30] sm:$0xff]   ;;  %v263_v12 = vld [vmem:[%s347_s3 + $0x38] sm:$0xff]  }
   0x4   :  { %235 = vmatpush3.bf16.msra.mxu1 %v256_v5  ;;  %v260_v9 = vld [vmem:[%s347_s3 + $0x20] sm:$0xff]  }
   0x5   :  { %236 = vmatprep.subr.bf16.mxu1 %v266_v0  ;;  %v206_v13 = vld [vmem:[%s348_s2] ss:$0 sm:$0xff] }
   0x6   :  { %231 = vmatmul.mubr.msk.bf16.vlgmr.msra.gmra.mrb[0].mxu0 %vm35_vm2, %v26_v4  ;;  %v208_v21 = vld [vmem:[%s349_s4] ss:$0 sm:$0xff] }
   0x8   :  { %237 = vmatpush3.bf16.msra.mxu1 %v257_v6 }
   0x9   :  { %238 = vmatprep.subr.bf16.mxu1 %v266_v0 }
   0xc   :  { %239 = vmatpush3.bf16.msra.mxu1 %v258_v7 }
   0xd   :  { %240 = vmatprep.subr.bf16.mxu1 %v266_v0 }
  0x10   :  { %241 = vmatpush3.bf16.msra.mxu1 %v259_v8 }
  0x11   :  { %242 = vmatprep.subr.bf16.mxu1 %v266_v0 }
  0x14   :  { %243 = vmatpush3.bf16.msra.mxu1 %v260_v9 }
  0x15   :  { %244 = vmatprep.subr.bf16.mxu1 %v266_v0 }
  0x18   :  { %245 = vmatpush3.bf16.msra.mxu1 %v261_v10 }
  0x19   :  { %246 = vmatprep.subr.bf16.mxu1 %v266_v0 }
  0x1c   :  { %247 = vmatpush3.bf16.msra.mxu1 %v262_v11 }
  0x1d   :  { %248 = vmatprep.subr.bf16.mxu1 %v266_v0 }
  0x20   :  { %249 = vmatpush3.bf16.msra.mxu1 %v263_v12 }
  0xd9   :  { %v77_v14 = vpop.f32.mrb[0].mxu0 }
  0xda   :  { %v78_v15 = vadd.f32 %v206_v13, %v77_v14  ;;  %v232_v16 = vpop.f32.mrb[1].mxu0 }
  0xdb   :  { %v80_v17 = vpop.f32.mrb[2].mxu0 }
  0xdc   :  { %v83_v18 = vmax.f32 %v78_v15, 0.0  ;;  %v233_v19 = vpop.f32.mrb[3].mxu0 }
  0xde   :  { %v84_v20 = vpack.c.bf16 %v83_v18, %v83_v18 }
  0xe0   :  { %251 = vmatmul.mubr.bf16.vlgmr.msra.gmra.mrb[0].mxu1 %v84_v20 }
 0x1b3   :  { %v190_v22 = vpop.f32.mrb[0].mxu1 }
 0x1b4   :  { %v191_v23 = vadd.f32 %v208_v21, %v190_v22  ;;  %v252_v24 = vpop.f32.mrb[1].mxu1 }
 0x1b5   :  { %v193_v25 = vpop.f32.mrb[2].mxu1 }
 0x1b6   :  { %264 = vtanh.f32 %v191_v23  ;;  %v253_v26 = vpop.f32.mrb[3].mxu1 }
 0x1c0   :  { %v265_v28 = vpop.eup %264 }
 0x1c1   :  { %v199_v29 = vmul.f32 %v265_v28, %v198_v27 }
 0x1c3   :  { %201 = vst.msk [vmem:[%s351_s6] sm:$0xff] %vm200_vm3, %v199_v29 }

</bundles_post_ra>
